<compile_context>
chip_gen: v7x
topology: tpu7x:2x2x1
jax: 0.10.0
libtpu: 0.0.40
codegen_flags: <defaults>
</compile_context>

<pallas_src>
import jax
import jax.numpy as jnp
from jax.experimental import pallas as pl
from jax.experimental.pallas import tpu as pltpu


def _round_up(x, m):
    return (x + m - 1) // m * m


def text_extractor_kernel(embs_ref, len_ref, inv_ref, w1_ref, b1_ref, w2_ref,
                          b2_ref, out_ref, acc_ref):
    l = pl.program_id(1)

    @pl.when(l == 0)
    def _():
        acc_ref[...] = jnp.zeros_like(acc_ref)

    bt, lt, _ = embs_ref.shape
    # Valid-token mask for this L tile, rebuilt from the per-row token count
    # (prefix attention mask).  Shape (Bt, Lt, 1); broadcast over H inside the
    # select.  It also zeroes any out-of-bounds rows of a ragged L / batch tile,
    # so `embs` never needs wrapper-side padding (and garbage can't leak as NaN).
    pos = jax.lax.broadcasted_iota(jnp.int32, (bt, lt, 1), 1) + l * lt
    valid = pos < len_ref[...]                         # (Bt,Lt,1) < (Bt,1,1)
    masked = jnp.where(valid, embs_ref[...], 0.0)      # native dtype, zero invalid
    acc_ref[...] += jnp.sum(masked, axis=1, dtype=jnp.float32)

    @pl.when(l == pl.num_programs(1) - 1)
    def _():
        # Exact reciprocal of the token count comes from the wrapper (free there).
        pooled = acc_ref[...] * inv_ref[...]           # [Bt, H] f32
        # LinearTransformation: [Bt, H] @ [H, D1] + b1   (f32 MXU, hidden under stream)
        x = jnp.dot(pooled, w1_ref[...],
                    preferred_element_type=jnp.float32) + b1_ref[...]
        # affine_aa + ReLU: [Bt, D1] @ [D1, D2] + b2
        y = jnp.dot(x, w2_ref[...],
                    preferred_element_type=jnp.float32) + b2_ref[...]
        out_ref[...] = jnp.maximum(y, 0.0).astype(out_ref.dtype)


def text_extractor_forward(embs, att_mask, w1, b1, w2, b2, *,
                           block_b=None, block_l=None):
    """Masked-mean pooling + Linear + Linear+ReLU head of TextExtractor.

    embs:     [B, L, H] token embeddings from the (untranslated) XLM-R encoder.
    att_mask: [B, L] tokenizer attention mask (prefix mask: 1s then 0s per row).
    w1, b1:   LinearTransformation params, stored [in, out] (PyTorch weight.T).
    w2, b2:   affine_aa params, stored [in, out].
    Returns   [B, D2] float32.
    """
    B, L, H = embs.shape
    D1 = w1.shape[1]
    D2 = w2.shape[1]
    itemsize = jnp.dtype(embs.dtype).itemsize
    sub = max(8, 32 // itemsize)          # sublane multiple (8 for f32, 16 for bf16)

    # --- batch tile: keep the "parallel" grid axis >= 2 so v7x's 2nd core works ---
    if block_b is None:
        Bt = min(128, _round_up(max(pl.cdiv(B, 2), 1), 8))
    else:
        Bt = _round_up(block_b, 8)
    Bt = max(8, min(Bt, _round_up(B, 8)))
    n_b = pl.cdiv(B, Bt)
    Bp = n_b * Bt

    # --- VMEM budget: explicit limit, L tile sized from what remains ---
    try:
        vmem_cap = pltpu.get_tpu_info().vmem_capacity_bytes
    except Exception:
        vmem_cap = 64 * 1024 * 1024       # conservative (v7x per-core VMEM)
    vmem_limit = min(100 * 2**20, int(vmem_cap * 0.85))
    resident = ((H * D1 + D1 + D1 * D2 + D2) * 4   # VMEM-resident f32 weights/biases
                + Bt * H * 4                        # f32 pooled-sum accumulator
                + 2 * Bt * D2 * 4)                  # double-buffered output block
    per_buf = (vmem_limit - resident - (4 << 20)) // 2
    per_buf = max(1 << 20, min(per_buf, 24 << 20))

    if block_l is None:
        Lt = per_buf // (Bt * H * itemsize)
    else:
        Lt = block_l
    Lt = max(sub, (Lt // sub) * sub)
    if Lt >= L:
        Lt = L                            # full-extent L block: no alignment needed
    n_l = pl.cdiv(L, Lt)

    # --- tiny per-row side inputs (no per-element mask stream into the kernel) ---
    f32 = jnp.float32
    denom = jnp.sum(att_mask.astype(f32), axis=1)              # valid-token counts [B]
    cnt = jnp.zeros((Bp,), f32).at[:B].set(denom)              # padded rows: 0 tokens
    inv = jnp.ones((Bp,), f32).at[:B].set(1.0 / denom)         # exact reciprocal
    len3 = cnt.astype(jnp.int32).reshape(Bp, 1, 1)
    inv2 = inv.reshape(Bp, 1)

    w1_f = w1.astype(f32)
    w2_f = w2.astype(f32)
    b1_2d = b1.reshape(1, D1).astype(f32)
    b2_2d = b2.reshape(1, D2).astype(f32)

    cost = pl.CostEstimate(
        flops=2 * B * L * H + 2 * Bp * (H * D1 + D1 * D2),
        transcendentals=0,
        bytes_accessed=(embs.size * itemsize + Bp * 8
                        + (H * D1 + D1 + D1 * D2 + D2) * 4 + Bp * D2 * 4))

    out_p = pl.pallas_call(
        text_extractor_kernel,
        out_shape=jax.ShapeDtypeStruct((Bp, D2), f32),
        grid_spec=pltpu.PrefetchScalarGridSpec(
            num_scalar_prefetch=0,
            grid=(n_b, n_l),
            in_specs=[
                # embs: streamed directly from HBM in its native dtype; ragged
                # last batch / L blocks are tolerated (kernel select masks them).
                pl.BlockSpec((Bt, Lt, H), lambda b, l: (b, l, 0)),
                # per-row token count / exact reciprocal (reused across all l).
                pl.BlockSpec((Bt, 1, 1), lambda b, l: (b, 0, 0)),
                pl.BlockSpec((Bt, 1), lambda b, l: (b, 0)),
                # weights/biases: whole-array, VMEM-resident, single copy.
                pl.BlockSpec(memory_space=pltpu.MemorySpace.VMEM),
                pl.BlockSpec(memory_space=pltpu.MemorySpace.VMEM),
                pl.BlockSpec(memory_space=pltpu.MemorySpace.VMEM),
                pl.BlockSpec(memory_space=pltpu.MemorySpace.VMEM),
            ],
            out_specs=pl.BlockSpec((Bt, D2), lambda b, l: (b, 0)),
            scratch_shapes=[pltpu.VMEM((Bt, H), jnp.float32)],
        ),
        compiler_params=pltpu.CompilerParams(
            dimension_semantics=("parallel", "arbitrary"),
            vmem_limit_bytes=vmem_limit),
        cost_estimate=cost,
    )(embs, len3, inv2, w1_f, b1_2d, w2_f, b2_2d)

    return out_p[:B]


def reference_forward(embs, att_mask, w1, b1, w2, b2):
    pooled = (embs * att_mask[:, :, None]).sum(axis=1) / att_mask.sum(
        axis=1, keepdims=True)
    x = pooled @ w1 + b1
    y = x @ w2 + b2
    return jnp.maximum(y, 0.0)


if __name__ == "__main__":
    # Small analogs of the real shapes (XLM-R large: H=1024, D1=768, D2=512;
    # tokenized report length a few hundred).
    B, L, H, D1, D2 = 10, 22, 32, 64, 48

    key = jax.random.PRNGKey(0)
    k_embs, k_w1, k_b1, k_w2, k_b2 = jax.random.split(key, 5)

    embs = jax.random.normal(k_embs, (B, L, H), dtype=jnp.float32)
    # Per-report valid token lengths (HF padding=True style prefix mask).
    lengths = jnp.maximum(L - 2 * jnp.arange(B, dtype=jnp.int32), 1)
    att_mask = (jnp.arange(L)[None, :] < lengths[:, None]).astype(jnp.float32)

    w1 = jax.random.normal(k_w1, (H, D1), dtype=jnp.float32) * 0.05
    b1 = jax.random.normal(k_b1, (D1,), dtype=jnp.float32) * 0.05
    w2 = jax.random.normal(k_w2, (D1, D2), dtype=jnp.float32) * 0.05
    b2 = jax.random.normal(k_b2, (D2,), dtype=jnp.float32) * 0.05

    # block_l=8 forces a 3-step L reduction with a ragged last L tile; B=10 with
    # Bt=8 exercises the ragged batch tile and a 2-wide "parallel" batch axis.
    out = text_extractor_forward(embs, att_mask, w1, b1, w2, b2, block_l=8)
    out = jax.block_until_ready(out)

    ref = reference_forward(embs, att_mask, w1, b1, w2, b2)
    assert out.shape == (B, D2)
    max_diff = jnp.max(jnp.abs(out - ref))
    assert jnp.allclose(out, ref, atol=1e-2, rtol=1e-2), (
        f"mismatch vs reference: max abs diff {max_diff}")

    print("KERNEL_OK")
</pallas_src>

<mosaic_0001>
module attributes {stable_mosaic.version = 11 : i64} {
  func.func @text_extractor_kernel(%arg0: i32, %arg1: i32, %arg2: memref<8x8x32xf32, #tpu.memory_space<vmem>>, %arg3: memref<8x1x1xi32, #tpu.memory_space<vmem>>, %arg4: memref<8x1xf32, #tpu.memory_space<vmem>>, %arg5: memref<32x64xf32, #tpu.memory_space<vmem>>, %arg6: memref<1x64xf32, #tpu.memory_space<vmem>>, %arg7: memref<64x48xf32, #tpu.memory_space<vmem>>, %arg8: memref<1x48xf32, #tpu.memory_space<vmem>>, %arg9: memref<8x48xf32, #tpu.memory_space<vmem>>, %arg10: memref<8x32xf32, #tpu.memory_space<vmem>>) attributes {dimension_semantics = [#tpu.dimension_semantics<parallel>, #tpu.dimension_semantics<arbitrary>], iteration_bounds = array<i64: 2, 3>, scalar_prefetch = 0 : i64, scratch_operands = 1 : i64, tpu.core_type = #tpu.core_type<tc>, window_params = [{transform_indices = @transform_0, window_bounds = array<i64: 8, 8, 32>}, {transform_indices = @transform_1, window_bounds = array<i64: 8, 1, 1>}, {transform_indices = @transform_2, window_bounds = array<i64: 8, 1>}, {pipeline_mode = #tpu.pipeline_mode<synchronous>, transform_indices = @transform_3, window_bounds = array<i64: 32, 64>}, {pipeline_mode = #tpu.pipeline_mode<synchronous>, transform_indices = @transform_4, window_bounds = array<i64: 1, 64>}, {pipeline_mode = #tpu.pipeline_mode<synchronous>, transform_indices = @transform_5, window_bounds = array<i64: 64, 48>}, {pipeline_mode = #tpu.pipeline_mode<synchronous>, transform_indices = @transform_6, window_bounds = array<i64: 1, 48>}, {transform_indices = @transform_7, window_bounds = array<i64: 8, 48>}]} {
    %c0_i32 = arith.constant 0 : i32
    %0 = arith.cmpi eq, %arg1, %c0_i32 : i32
    %1 = arith.extui %0 : i1 to i32
    %c0_i32_0 = arith.constant 0 : i32
    %2 = arith.cmpi ne, %1, %c0_i32_0 : i32
    scf.if %2 {
      %cst_12 = arith.constant 0.000000e+00 : f32
      %22 = vector.broadcast %cst_12 : f32 to vector<8x32xf32>
      %c0_13 = arith.constant 0 : index
      %c0_14 = arith.constant 0 : index
      %23 = vector.load %arg10[%c0_13, %c0_14] : memref<8x32xf32, #tpu.memory_space<vmem>>, vector<8x32xf32>
      tpu.vector_store %arg10[%c0_13, %c0_14], %22 {strides = array<i32>} : memref<8x32xf32, #tpu.memory_space<vmem>>, vector<8x32xf32>,
    } else {
    }
    %3 = tpu.iota {dimensions = array<i32: 1>} : vector<8x8x1xi32>
    %c8_i32 = arith.constant 8 : i32
    %4 = arith.muli %arg1, %c8_i32 : i32
    %5 = vector.broadcast %4 : i32 to vector<8x8x1xi32>
    %6 = arith.addi %3, %5 : vector<8x8x1xi32>
    %c0 = arith.constant 0 : index
    %c0_1 = arith.constant 0 : index
    %c0_2 = arith.constant 0 : index
    %7 = vector.load %arg3[%c0, %c0_1, %c0_2] : memref<8x1x1xi32, #tpu.memory_space<vmem>>, vector<8x1x1xi32>
    %8 = vector.broadcast %7 : vector<8x1x1xi32> to vector<8x8x1xi32>
    %9 = arith.cmpi slt, %6, %8 : vector<8x8x1xi32>
    %c0_3 = arith.constant 0 : index
    %c0_4 = arith.constant 0 : index
    %c0_5 = arith.constant 0 : index
    %10 = vector.load %arg2[%c0_3, %c0_4, %c0_5] : memref<8x8x32xf32, #tpu.memory_space<vmem>>, vector<8x8x32xf32>
    %cst = arith.constant 0.000000e+00 : f32
    %11 = vector.shape_cast %9 : vector<8x8x1xi1> to vector<8x8x1xi1>
    %12 = vector.broadcast %11 : vector<8x8x1xi1> to vector<8x8x32xi1>
    %13 = vector.broadcast %cst : f32 to vector<8x8x32xf32>
    %14 = arith.select %12, %10, %13 : vector<8x8x32xi1>, vector<8x8x32xf32>
    %c0_6 = arith.constant 0 : index
    %c0_7 = arith.constant 0 : index
    %15 = vector.load %arg10[%c0_6, %c0_7] : memref<8x32xf32, #tpu.memory_space<vmem>>, vector<8x32xf32>
    %cst_8 = arith.constant dense<0.000000e+00> : vector<8x32xf32>
    %16 = vector.multi_reduction <add>, %14, %cst_8 [1] : vector<8x8x32xf32> to vector<8x32xf32>
    %17 = arith.addf %15, %16 : vector<8x32xf32>
    %c0_9 = arith.constant 0 : index
    %c0_10 = arith.constant 0 : index
    %18 = vector.load %arg10[%c0_9, %c0_10] : memref<8x32xf32, #tpu.memory_space<vmem>>, vector<8x32xf32>
    tpu.vector_store %arg10[%c0_9, %c0_10], %17 {strides = array<i32>} : memref<8x32xf32, #tpu.memory_space<vmem>>, vector<8x32xf32>,
    %c2_i32 = arith.constant 2 : i32
    %19 = arith.cmpi eq, %arg1, %c2_i32 : i32
    %20 = arith.extui %19 : i1 to i32
    %c0_i32_11 = arith.constant 0 : i32
    %21 = arith.cmpi ne, %20, %c0_i32_11 : i32
    scf.if %21 {
      %c0_12 = arith.constant 0 : index
      %c0_13 = arith.constant 0 : index
      %22 = vector.load %arg10[%c0_12, %c0_13] : memref<8x32xf32, #tpu.memory_space<vmem>>, vector<8x32xf32>
      %c0_14 = arith.constant 0 : index
      %c0_15 = arith.constant 0 : index
      %23 = vector.load %arg4[%c0_14, %c0_15] : memref<8x1xf32, #tpu.memory_space<vmem>>, vector<8x1xf32>
      %24 = vector.broadcast %23 : vector<8x1xf32> to vector<8x32xf32>
      %25 = arith.mulf %22, %24 : vector<8x32xf32>
      %c0_16 = arith.constant 0 : index
      %c0_17 = arith.constant 0 : index
      %26 = vector.load %arg5[%c0_16, %c0_17] : memref<32x64xf32, #tpu.memory_space<vmem>>, vector<32x64xf32>
      %cst_18 = arith.constant dense<0.000000e+00> : vector<8x64xf32>
      %27 = tpu.matmul %25, %26, %cst_18 {dimension_numbers = #tpu.dot_dimension_numbers<[1], [0], [0], [1], [0, 0, 1, 1], [], []>} : vector<8x32xf32>, vector<32x64xf32>, vector<8x64xf32> -> vector<8x64xf32>
      %c0_19 = arith.constant 0 : index
      %c0_20 = arith.constant 0 : index
      %28 = vector.load %arg6[%c0_19, %c0_20] : memref<1x64xf32, #tpu.memory_space<vmem>>, vector<1x64xf32>
      %29 = vector.broadcast %28 : vector<1x64xf32> to vector<8x64xf32>
      %30 = arith.addf %27, %29 : vector<8x64xf32>
      %c0_21 = arith.constant 0 : index
      %c0_22 = arith.constant 0 : index
      %31 = vector.load %arg7[%c0_21, %c0_22] : memref<64x48xf32, #tpu.memory_space<vmem>>, vector<64x48xf32>
      %cst_23 = arith.constant dense<0.000000e+00> : vector<8x48xf32>
      %32 = tpu.matmul %30, %31, %cst_23 {dimension_numbers = #tpu.dot_dimension_numbers<[1], [0], [0], [1], [0, 0, 1, 1], [], []>} : vector<8x64xf32>, vector<64x48xf32>, vector<8x48xf32> -> vector<8x48xf32>
      %c0_24 = arith.constant 0 : index
      %c0_25 = arith.constant 0 : index
      %33 = vector.load %arg8[%c0_24, %c0_25] : memref<1x48xf32, #tpu.memory_space<vmem>>, vector<1x48xf32>
      %34 = vector.broadcast %33 : vector<1x48xf32> to vector<8x48xf32>
      %35 = arith.addf %32, %34 : vector<8x48xf32>
      %cst_26 = arith.constant 0.000000e+00 : f32
      %36 = vector.broadcast %cst_26 : f32 to vector<8x48xf32>
      %37 = arith.maximumf %35, %36 : vector<8x48xf32>
      %c0_27 = arith.constant 0 : index
      %c0_28 = arith.constant 0 : index
      %38 = vector.load %arg9[%c0_27, %c0_28] : memref<8x48xf32, #tpu.memory_space<vmem>>, vector<8x48xf32>
      tpu.vector_store %arg9[%c0_27, %c0_28], %37 {strides = array<i32>} : memref<8x48xf32, #tpu.memory_space<vmem>>, vector<8x48xf32>,
    } else {
    }
    return
  }
  func.func @transform_0(%arg0: i32, %arg1: i32) -> (i32, i32, i32) {
    %c0_i32 = arith.constant 0 : i32
    %c0_i32_0 = arith.constant 0 : i32
    return %arg0, %arg1, %c0_i32 : i32, i32, i32
  }
  func.func @transform_1(%arg0: i32, %arg1: i32) -> (i32, i32, i32) {
    %c0_i32 = arith.constant 0 : i32
    %c0_i32_0 = arith.constant 0 : i32
    %c0_i32_1 = arith.constant 0 : i32
    return %arg0, %c0_i32, %c0_i32_0 : i32, i32, i32
  }
  func.func @transform_2(%arg0: i32, %arg1: i32) -> (i32, i32) {
    %c0_i32 = arith.constant 0 : i32
    %c0_i32_0 = arith.constant 0 : i32
    return %arg0, %c0_i32 : i32, i32
  }
  func.func @transform_3(%arg0: i32, %arg1: i32) -> (i32, i32) {
    %c0_i32 = arith.constant 0 : i32
    %c0_i32_0 = arith.constant 0 : i32
    %c0_i32_1 = arith.constant 0 : i32
    return %c0_i32, %c0_i32_0 : i32, i32
  }
  func.func @transform_4(%arg0: i32, %arg1: i32) -> (i32, i32) {
    %c0_i32 = arith.constant 0 : i32
    %c0_i32_0 = arith.constant 0 : i32
    %c0_i32_1 = arith.constant 0 : i32
    return %c0_i32, %c0_i32_0 : i32, i32
  }
  func.func @transform_5(%arg0: i32, %arg1: i32) -> (i32, i32) {
    %c0_i32 = arith.constant 0 : i32
    %c0_i32_0 = arith.constant 0 : i32
    %c0_i32_1 = arith.constant 0 : i32
    return %c0_i32, %c0_i32_0 : i32, i32
  }
  func.func @transform_6(%arg0: i32, %arg1: i32) -> (i32, i32) {
    %c0_i32 = arith.constant 0 : i32
    %c0_i32_0 = arith.constant 0 : i32
    %c0_i32_1 = arith.constant 0 : i32
    return %c0_i32, %c0_i32_0 : i32, i32
  }
  func.func @transform_7(%arg0: i32, %arg1: i32) -> (i32, i32) {
    %c0_i32 = arith.constant 0 : i32
    %c0_i32_0 = arith.constant 0 : i32
    return %arg0, %c0_i32 : i32, i32
  }
}

</mosaic_0001>

<bundles_post_ra>
// kernel: tpu_custom_call.1
= control target key start
LH: loop header
LB: loop body
LE: loop exit
PB: predicated region body
PF: predicated region fallthrough
CT: control target
= control target key end

     0   :  { %s1586_s0 = inlined_call_operand.hbm [shape: f32[10,22,32], index: 0, kind: input, shape index: {}]   ;;  %s1587_s1 = inlined_call_operand.vmem [shape: s32[16,1,1], index: 1, kind: input, shape index: {}]   ;;  %s1588_s2 = inlined_call_operand.vmem [shape: f32[16,1], index: 2, kind: input, shape index: {}]   ;;  %s1589_s3 = inlined_call_operand.vmem [shape: f32[32,64], index: 3, kind: input, shape index: {}]   ;;  %s1590_s4 = inlined_call_operand.vmem [shape: f32[1,64], index: 4, kind: input, shape index: {}]   ;;  %s1591_s5 = inlined_call_operand.vmem [shape: f32[64,48], index: 5, kind: input, shape index: {}]   ;;  %s1592_s6 = inlined_call_operand.vmem [shape: f32[1,48], index: 6, kind: input, shape index: {}]   ;;  %s1593_s7 = inlined_call_operand.hbm [shape: f32[16,48], index: 7, kind: output, shape index: {}]  }
   0x1   :  { %1599 = sst [smem:[#allocation15_spill]] %s1593_s7 }
   0x2   :  { %12 = vsyncpa [#allocation4], 0 }
   0x3   :  { %14 = vsyncpa [#allocation4 + $0x1], 0 }
   0x4   :  { %15 = vsyncpa [#allocation5], 0 }
   0x5   :  { %17 = vsyncpa [#allocation5 + $0x1], 0  ;;  %s1274_s24 = smov 0   ;;  %s1276_s25 = smov 0  }
   0x6   :  { %s1278_s26 = smov 0   ;;  %s1280_s27 = smov 0  }
   0x7   :  { %s1282_s28 = smov 0   ;;  %s1284_s29 = smov 0  }
   0x8   :  { %s1286_s30 = smov 0   ;;  %s1288_s8 = smov 0  }
   0x9   :  { %s1290_s9 = smov 0   ;;  %s1292_s10 = smov 0  }
   0xa   :  { %s1294_s11 = smov 0  }
   0xb LB: > { %1600 = sst [smem:[#allocation9_spill]] %s1201_s29  ;;  %s864_s12 = sadd.s32 4294967295, %s1221_s11   ;;  %s1221_s11 = sphi %s1294_s11, %s23_s11   ;;  %s1217_s10 = sphi %s1292_s10, %s1617_s10   ;;  %s1213_s9 = sphi %s1290_s9, %s1625_s9   ;;  %s1209_s8 = sphi %s1288_s8, %s1615_s8   ;;  %s1205_s30 = sphi %s1286_s30, %s1624_s30   ;;  %s1201_s29 = sphi %s1284_s29, %s1623_s29   ;;  %s1197_s28 = sphi %s1282_s28, %s1622_s28   ;;  %s1193_s27 = sphi %s1280_s27, %s1621_s27   ;;  %s1189_s26 = sphi %s1278_s26, %s1620_s26   ;;  %s1185_s25 = sphi %s1276_s25, %s1619_s25   ;;  %s1181_s24 = sphi %s1274_s24, %s1618_s24  }
   0xc   : > { %1601 = sst [smem:[#allocation10_spill]] %s1217_s10  ;;  %s865_s13 = sadd.s32 4294967294, %s1221_s11  }
   0xd   : > { %s32_s14 = sadd.s32 1, %s1213_s9  ;;  %s35_s15 = sadd.s32 1, %s1217_s10 }
   0xe   : > { %p33_p0 = scmp.ge.s32.totalorder %s32_s14, 3  ;;  %s44_s16 = sadd.s32 1, %s1201_s29 }
   0xf   : > { %p51_p1 = scmp.ne.s32.totalorder %s1201_s29, %s1197_s28  ;;  %p52_p2 = scmp.eq.s32.totalorder %s1221_s11, 0 }
  0x10   : > { %s1627_s14 = smov (%p33_p0, %s32_s14), 0  ;;  %s1629_s15 = smov (!%p33_p0, %s35_s15), %s1217_s10 }
  0x11   : > { %1602 = sst [smem:[#allocation11_spill]] %s1627_s14  ;;  %s40_s17 = ssub.s32 %s1213_s9, %s1627_s14 }
  0x12   : > { %p1340_p3 = por %p52_p2, %p51_p1  ;;  %p37_p4 = scmp.ge.s32.totalorder %s1629_s15, 2 }
  0x13   : > { %p57_p5 = scmp.ne.s32.totalorder %s1197_s28, %s1193_s27  ;;  %p58_p6 = scmp.eq.s32.totalorder %s864_s12, 0 }
  0x14   : > { %s206_s19 = sadd.s32 1, %s1189_s26  ;;  %s1631_s15 = smov (%p37_p4, %s1629_s15), 0 }
  0x15   : > { %1604 = sst [smem:[#allocation12_spill]] %s1631_s15  ;;  %p1348_p7 = por %p58_p6, %p57_p5 }
  0x16   : > { %p216_p8 = scmp.ne.s32.totalorder %s1189_s26, %s1185_s25  ;;  %s39_s21 = ssub.s32 %s1217_s10, %s1631_s15 }
  0x17   : > { %p217_p9 = scmp.eq.s32.totalorder %s864_s12, 5  ;;  %s41_s22 = sor.u32 %s40_s17, %s39_s21 }
  0x18   : > { %p204_p10 = scmp.eq.s32.totalorder %s39_s21, 0  ;;  %p42_p11 = scmp.eq.s32.totalorder %s41_s22, 0 }
  0x19   : > { %p1356_p12 = por %p217_p9, %p216_p8  ;;  %p222_p13 = scmp.ne.s32.totalorder %s1185_s25, %s1181_s24 }
  0x1a   : > { %s1361_s27 = scalar_select %p204_p10, %s1189_s26, %s206_s19  }
  0x1b   : > { %s1364_s14 = scalar_select %p42_p11, %s1201_s29, %s44_s16  }
  0x1c   : > { %1607 = sst [smem:[#allocation13_spill]] %s1361_s27  ;;  %p223_p0 = scmp.eq.s32.totalorder %s865_s13, 5 }
  0x1d   : > { %1608 = sst [smem:[#allocation14_spill]] %s1364_s14  ;;  %p867_p2 = scmp.ge.s32.totalorder %s1221_s11, 6 }
  0x1e   : > { %p1368_p1 = por %p223_p0, %p222_p13 }
  0x1f   : > { %251 = sbr.rel (%p867_p2) target bundleno = 76 (0x4c), region = 32 }
  0x20   : > { %s1609_s7 = scalar_select %p1368_p1, 1, 0 }
  0x26   : > { %254 = sbr.rel (!%p1340_p3) target bundleno = 76 (0x4c), region = 36  ;;  %s255_s12 = sand.u32 (%p1340_p3), 1, %s1201_s29  }
  0x27   : > { %s869_s17 = sshll.u32 (%p1340_p3), %s1217_s10, 3  ;;  %s868_s19 = sshll.u32 (%p1340_p3), %s255_s12, 6 }
  0x28   : > { %s261_s21 = ssub.s32 (%p1340_p3), 10, %s869_s17  ;;  %s1380_s22 = scalar_lea.sflag (%p1340_p3), [#allocation4], %s255_s12 }
  0x29   : > { %p262_p4 = scmp.lt.s32.totalorder (%p1340_p3), %s261_s21, 8  ;;  %s259_s15 = scalar_lea.vmem (%p1340_p3), [#allocation3], %s868_s19 }
  0x2d   : > { %s1633_s21 = smov (!%p262_p4, %s261_s21), 8 }
  0x2e   : > { %s1377_s16 = sshll.u32 %s1633_s21, 7 }
  0x2f   : > { %s266_s13 = ssub.s32 1024, %s1377_s16 }
  0x30   : > { %267 = vsyncadd %s1380_s22, %s266_s13  ;;  %p871_p3 = scmp.ne.s32.totalorder %s1377_s16, 0  ;;  %s962_s18 = smul.u32 24, %s1217_s10 }
  0x31   : > { %s274_s14 = sshll.u32 %s259_s15, 4  ;;  %s1386_s14 = int_to_ptr.vmem [resolvable:$true] %s274_s14 }
  0x32   : > { %s270_s17 = sadd.s32 %s1213_s9, %s962_s18  ;;  %s1075_s18 = scalar_lea.hbm %s1586_s0, 3840 }
  0x33   : > { %s873_s21 = sshll.u32 %s270_s17, 7 }
  0x34   : > { %s1391_s12 = scalar_lea.hbm %s1586_s0, %s873_s21 }
  0x35   : > { %s1071_s19 = scalar_lea.hbm %s1391_s12, %s1377_s16  ;;  %p1076_p9 = scmp.lt.u32.totalorder %s1391_s12, %s1586_s0 }
  0x36   : > { %p1072_p5 = scmp.ne.s32.totalorder %s1391_s12, %s1071_s19  ;;  %p1077_p10 = scmp.lt.u32.totalorder %s1075_s18, %s1071_s19 }
  0x37   : > { %p1079_p13 = scmp.lt.u32.totalorder %s1071_s19, %s1391_s12 }
  0x38   : > { %p1073_p6 = pnand %p1072_p5, %p871_p3  ;;  %p1078_p11 = por %p1077_p10, %p1076_p9 }
  0x3a   : > { %p1074_p8 = pneg %p1073_p6  ;;  %p1080_p0 = por %p1079_p13, %p1078_p11 }
  0x3c   : > { %p1081_p2 = pnand %p1080_p0, %p1074_p8 }
  0x3e   : > { %1084 = shalt.err (!%p1081_p2)
}
  0x3f   : > { %s1085_s29 = scalar_lea.vmem %s1386_s14, %s1377_s16  ;;  %s1223_s27 = smov [#allocation3]  }
  0x40   : > { %p1086_p4 = scmp.ne.s32.totalorder %s1386_s14, %s1085_s29  ;;  %s1089_s21 = sshll.u32 %s1223_s27, 4  ;;  %s1090_s21 = int_to_ptr.vmem [resolvable:$false] %s1089_s21 }
  0x41   : > { %s1091_s10 = scalar_lea.vmem %s1090_s21, 2048  ;;  %p1092_p1 = scmp.lt.s32.totalorder %s1386_s14, %s1090_s21 }
  0x42   : > { %p1087_p5 = pnand %p1086_p4, %p871_p3  ;;  %p1093_p9 = scmp.lt.s32.totalorder %s1091_s10, %s1085_s29 }
  0x44   : > { %p1088_p6 = pneg %p1087_p5  ;;  %p1094_p10 = por %p1093_p9, %p1092_p1 }
  0x46   : > { %p1095_p11 = pnand %p1094_p10, %p1088_p6 }
  0x48   : > { %1098 = shalt.err (!%p1095_p11)
}
  0x49   : > { %s1224_s19 = smov 384   ;;  %s1225_s13 = smov 128  }
  0x4a   : > { %s1226_s15 = smov 8  }
  0x4b   : > { %280 = dma.hbm_to_vmem [thread:$0]  (%p871_p3), %s1391_s12, %s1377_s16, %s1386_s14, %s1380_s22, %s1224_s19, %s1225_s13, %s1226_s15  }
  0x4c PF: > { %p876_p8 = scmp.ge.s32.totalorder %s1221_s11, 1  ;;  %p297_p13 = scmp.lt.s32.totalorder %s1221_s11, 7 }
  0x4e   : > { %p298_p0 = pnand %p876_p8, %p297_p13 }
  0x4f   : > { %s303_s18 = sand.u32 (!%p298_p0), 1, %s1197_s28  }
  0x50   : > { %301 = sbr.rel (%p298_p0) target bundleno = 840 (0x348), region = 48  ;;  %s877_s17 = sshll.u32 (!%p298_p0), %s303_s18, 6 }
  0x51   : > { %s304_s29 = scalar_lea.sflag (!%p298_p0), [#allocation4], %s303_s18  ;;  %s1421_s27 = scalar_lea.vmem (!%p298_p0), [#allocation3], %s877_s17 }
  0x57   : > { %1172 = dma.done.wait (%p1348_p7), %s304_s29, 1024  }
  0x58   : > { %1174 = vsyncadd (%p1348_p7), %s304_s29, 4294966272  ;;  %s343_s14 = sand.u32 1, %s1185_s25   ;;  %s879_s16 = sshll.u32 %s1209_s8, 3 }
  0x59   : > { %s1431_s22 = sshll.u32 %s343_s14, 3  ;;  %p352_p1 = scmp.lt.s32.totalorder %s879_s16, 15 }
  0x5a   : > { %p356_p3 = scmp.lt.s32.totalorder %s1209_s8, 1  ;;  %s345_s17 = scalar_lea.vmem [#allocation6], %s1431_s22 }
  0x5b   : > { %s1635_s16 = smov (!%p352_p1, %s879_s16), 15  ;;  %p881_p7 = scmp.ne.s32.totalorder %s1205_s30, 0 }
  0x5c   : > { %s357_s12 = scalar_select %p356_p3, %s1209_s8, 1 }
  0x5d   : > { %s1438_s20 = scalar_lea.vmem %s1587_s1, %s1635_s16  ;;  %363 = sbr.rel (%p881_p7) target bundleno = 100 (0x64), region = 56  ;;  %vm364_vm0 = vcmask (!%p881_p7), 261120   ;;  %v1227_v0 = vmov (!%p881_p7), 0.0  }
  0x5e   : > { %s880_s19 = sshll.u32 %s357_s12, 3  ;;  %365 = vst.msk [vmem:[#allocation2] sm:$0xff] (!%p881_p7), %vm364_vm0, %v1227_v0 }
  0x5f   : > { %s1443_s18 = scalar_lea.vmem %s1588_s2, %s880_s19 }
  0x64 PF: > { %v366_v1 = vlaneseq  ;;  %s882_s29 = sshll.u32 %s1205_s30, 3  ;;  %v1228_v2 = vmov 0   ;;  %v885_v5 = vld [vmem:[%s1438_s20 + $0x2] ss:$0 sm:$0xff]  ;;  %v883_v6 = vld [vmem:[%s1438_s20] ss:$0 sm:$0xff] }
  0x65   : > { %1069 = vset.pattern.permute.xlu1 %v1228_v2  ;;  %1068 = vset.pattern.permute.xlu0 %v1228_v2  ;;  %v369_v3 = vstv %s882_s29  ;;  %v886_v7 = vld [vmem:[%s1438_s20 + $0x3] ss:$0 sm:$0xff]  ;;  %v884_v8 = vld [vmem:[%s1438_s20 + $0x1] ss:$0 sm:$0xff]  ;;  %v888_v12 = vld [vmem:[%s1438_s20 + $0x5] ss:$0 sm:$0xff] }
  0x66   : > { %v367_v4 = vshrl.u32 %v366_v1, 7  ;;  %v887_v13 = vld [vmem:[%s1438_s20 + $0x4] ss:$0 sm:$0xff]  ;;  %v890_v16 = vld [vmem:[%s1438_s20 + $0x7] ss:$0 sm:$0xff]  ;;  %v421_v22 = vld [vmem:[%s1421_s27 + $0x10] sm:$0xff] }
  0x67   : > { %v889_v17 = vld [vmem:[%s1438_s20 + $0x6] ss:$0 sm:$0xff]  ;;  %v419_v23 = vld [vmem:[%s1421_s27] sm:$0xff]  ;;  %vm476_vm9 = vcmask 261120   ;;  %v420_v31 = vld [vmem:[%s1421_s27 + $0x8] sm:$0xff]  ;;  %vm541_vm0 = vcmask 1041409  }
  0x68   : > { %v370_v9 = vadd.s32 %v369_v3, %v367_v4  ;;  %v422_v30 = vld [vmem:[%s1421_s27 + $0x18] sm:$0xff]  ;;  %v424_v46 = vld [vmem:[%s1421_s27 + $0x28] sm:$0xff]  ;;  %v423_v48 = vld [vmem:[%s1421_s27 + $0x20] sm:$0xff]  ;;  %p891_p2 = scmp.ne.s32.totalorder %s1205_s30, 2 }
  0x69   : > { %v426_v58 = vld [vmem:[%s1421_s27 + $0x38] sm:$0xff]  ;;  %v425_v60 = vld [vmem:[%s1421_s27 + $0x30] sm:$0xff] }
  0x6a   : > { %vm413_vm1 = vcmp.lt.s32.totalorder %v370_v9, %v885_v5  ;;  %vm411_vm2 = vcmp.lt.s32.totalorder %v370_v9, %v883_v6  ;;  %vm414_vm3 = vcmp.lt.s32.totalorder %v370_v9, %v886_v7  ;;  %vm412_vm4 = vcmp.lt.s32.totalorder %v370_v9, %v884_v8 }
  0x6b   : > { %v429_v10 = vsel %vm413_vm1, 1, %v1228_v2  ;;  %v427_v11 = vsel %vm411_vm2, 1, %v1228_v2  ;;  %v430_v14 = vsel %vm414_vm3, 1, %v1228_v2  ;;  %v428_v15 = vsel %vm412_vm4, 1, %v1228_v2 }
  0x6c   : > { %442 = vperm.xlu1 %1069, %v429_v10   ;;  %436 = vperm.xlu0 %1068, %v427_v11   ;;  %vm416_vm5 = vcmp.lt.s32.totalorder %v370_v9, %v888_v12  ;;  %vm415_vm6 = vcmp.lt.s32.totalorder %v370_v9, %v887_v13  ;;  %vm418_vm7 = vcmp.lt.s32.totalorder %v370_v9, %v890_v16  ;;  %vm543_vm3 = vcmask 1042434  }
  0x6d   : > { %v432_v18 = vsel %vm416_vm5, 1, %v1228_v2  ;;  %v431_v19 = vsel %vm415_vm6, 1, %v1228_v2  ;;  %vm417_vm8 = vcmp.lt.s32.totalorder %v370_v9, %v889_v17  ;;  %v434_v20 = vsel %vm418_vm7, 1, %v1228_v2 }
  0x6e   : > { %v433_v21 = vsel %vm417_vm8, 1, %v1228_v2  ;;  %vm545_vm4 = vcmask 1043459   ;;  %vm547_vm5 = vcmask 1044484   ;;  %vm549_vm6 = vcmask 1045509  }
  0x6f   : > { %vm551_vm7 = vcmask 1046534   ;;  %vm553_vm8 = vcmask 1047559  }
  0x70   : > { %445 = vperm.xlu1 %1069, %v430_v14   ;;  %439 = vperm.xlu0 %1068, %v428_v15  }
  0x74   : > { %451 = vperm.xlu1 %1069, %v432_v18   ;;  %448 = vperm.xlu0 %1068, %v431_v19  }
  0x78   : > { %457 = vperm.xlu1 %1069, %v434_v20   ;;  %454 = vperm.xlu0 %1068, %v433_v21  }
  0xeb   : > { %v443_v24 = vpop.permute.xlu1 %442  ;;  %v437_v25 = vpop.permute.xlu0 %436 }
  0xec   : > { %vm461_vm10 = vcmp.eq.s32.totalorder %v443_v24, 1  ;;  %vm459_vm11 = vcmp.eq.s32.totalorder %v437_v25, 1 }
  0xed   : > { %v469_v26 = vsel %vm461_vm10, %v421_v22, 0.0  ;;  %v467_v27 = vsel %vm459_vm11, %v419_v23, 0.0  ;;  %vm1231_vm10 = vmmov (!%p891_p2), 0   ;;  %vm669_vm11 = vcmask (!%p891_p2), 523264  }
  0xee   : > { %v491_v28 = vsel %vm476_vm9, %v469_v26, 0.0  ;;  %v477_v29 = vsel %vm476_vm9, %v467_v27, 0.0 }
  0xef   : > { %v492_v32 = vrot.slane %v491_v28, 4  ;;  %v478_v33 = vrot.slane %v477_v29, 4  ;;  %v446_v34 = vpop.permute.xlu1 %445  ;;  %v440_v35 = vpop.permute.xlu0 %439 }
  0xf0   : > { %vm462_vm12 = vcmp.eq.s32.totalorder %v446_v34, 1  ;;  %vm460_vm13 = vcmp.eq.s32.totalorder %v440_v35, 1 }
  0xf1   : > { %v493_v36 = vadd.f32 %v492_v32, %v491_v28  ;;  %v479_v37 = vadd.f32 %v478_v33, %v477_v29  ;;  %v470_v38 = vsel %vm462_vm12, %v422_v30, 0.0  ;;  %v468_v39 = vsel %vm460_vm13, %v420_v31, 0.0 }
  0xf2   : > { %v498_v40 = vsel %vm476_vm9, %v470_v38, 0.0  ;;  %v484_v41 = vsel %vm476_vm9, %v468_v39, 0.0 }
  0xf3   : > { %v494_v42 = vrot.slane %v493_v36, 2  ;;  %v480_v43 = vrot.slane %v479_v37, 2  ;;  %v499_v44 = vrot.slane %v498_v40, 4  ;;  %v485_v45 = vrot.slane %v484_v41, 4  ;;  %v452_v47 = vpop.permute.xlu1 %451  ;;  %v449_v49 = vpop.permute.xlu0 %448 }
  0xf4   : > { %vm464_vm14 = vcmp.eq.s32.totalorder %v452_v47, 1  ;;  %vm463_vm15 = vcmp.eq.s32.totalorder %v449_v49, 1  ;;  %v563_v47 = vld [vmem:[%s1443_s18] sm:$0xff] (!%p891_p2)  ;;  %v571_v49 = vld [vmem:[%s1589_s3 + $0x8] sm:$0xff] (!%p891_p2) }
  0xf5   : > { %v495_v50 = vadd.f32 %v494_v42, %v493_v36  ;;  %v481_v51 = vadd.f32 %v480_v43, %v479_v37  ;;  %v500_v52 = vadd.f32 %v499_v44, %v498_v40  ;;  %v486_v53 = vadd.f32 %v485_v45, %v484_v41  ;;  %v475_v42 = vld [vmem:[#allocation2] sm:$0xff] }
  0xf6   : > { %v472_v54 = vsel %vm464_vm14, %v424_v46, 0.0  ;;  %v471_v55 = vsel %vm463_vm15, %v423_v48, 0.0  ;;  %v570_v48 = vld [vmem:[%s1589_s3] sm:$0xff] (!%p891_p2) }
  0xf7   : > { %v501_v56 = vrot.slane %v500_v52, 2  ;;  %v487_v57 = vrot.slane %v486_v53, 2  ;;  %v458_v59 = vpop.permute.xlu1 %457  ;;  %v455_v61 = vpop.permute.xlu0 %454  ;;  %v512_v62 = vsel %vm476_vm9, %v472_v54, 0.0  ;;  %v505_v63 = vsel %vm476_vm9, %v471_v55, 0.0  ;;  %v573_v54 = vld [vmem:[%s1589_s3 + $0x18] sm:$0xff] (!%p891_p2) }
  0xf8   : > { %vm466_vm1 = vcmp.eq.s32.totalorder %v458_v59, 1  ;;  %vm465_vm2 = vcmp.eq.s32.totalorder %v455_v61, 1  ;;  %v496_v0 = vrot.slane %v495_v50, 1  ;;  %v482_v1 = vrot.slane %v481_v51, 1  ;;  %v656_v59 = vld [vmem:[%s1591_s5 + $0x10] sm:$0xff] (!%p891_p2)  ;;  %v657_v61 = vld [vmem:[%s1591_s5 + $0x18] sm:$0xff] (!%p891_p2) }
  0xf9   : > { %v502_v2 = vadd.f32 %v501_v56, %v500_v52  ;;  %v488_v3 = vadd.f32 %v487_v57, %v486_v53  ;;  %v513_v4 = vrot.slane %v512_v62, 4  ;;  %v506_v5 = vrot.slane %v505_v63, 4  ;;  %v572_v53 = vld [vmem:[%s1589_s3 + $0x10] sm:$0xff] (!%p891_p2)  ;;  %v654_v57 = vld [vmem:[%s1591_s5] sm:$0xff] (!%p891_p2) }
  0xfa   : > { %v474_v6 = vsel %vm466_vm1, %v426_v58, 0.0  ;;  %v473_v7 = vsel %vm465_vm2, %v425_v60, 0.0  ;;  %v497_v15 = vadd.f32 %v496_v0, %v495_v50  ;;  %v483_v16 = vadd.f32 %v482_v1, %v481_v51  ;;  %v655_v58 = vld [vmem:[%s1591_s5 + $0x8] sm:$0xff] (!%p891_p2) }
  0xfb   : > { %v489_v8 = vrot.slane %v488_v3, 1  ;;  %v526_v9 = vsel %vm476_vm9, %v474_v6, 0.0  ;;  %v519_v10 = vsel %vm476_vm9, %v473_v7, 0.0  ;;  %v514_v11 = vadd.f32 %v513_v4, %v512_v62  ;;  %v659_v0 = vld [vmem:[%s1591_s5 + $0x28] sm:$0xff] (!%p891_p2)  ;;  %v661_v6 = vld [vmem:[%s1591_s5 + $0x38] sm:$0xff] (!%p891_p2) }
  0xfc   : > { %v507_v12 = vadd.f32 %v506_v5, %v505_v63  ;;  %v527_v13 = vrot.slane %v526_v9, 4  ;;  %v520_v14 = vrot.slane %v519_v10, 4  ;;  %v503_v17 = vrot.slane %v502_v2, 1  ;;  %v658_v63 = vld [vmem:[%s1591_s5 + $0x20] sm:$0xff] (!%p891_p2)  ;;  %v660_v5 = vld [vmem:[%s1591_s5 + $0x30] sm:$0xff] (!%p891_p2) }
  0xfd   : > { %v490_v18 = vadd.f32 %v489_v8, %v488_v3  ;;  %v515_v19 = vrot.slane %v514_v11, 2  ;;  %v1229_v50 = vmov (!%p891_p2), 0   ;;  %v1230_v51 = vmov (!%p891_p2), 0.0|0.0   ;;  %v892_v8 = vld [vmem:[%s1590_s4] ss:$0 sm:$0xff] (!%p891_p2) }
  0xfe   : > { %v508_v20 = vrot.slane %v507_v12, 2  ;;  %v528_v21 = vadd.f32 %v527_v13, %v526_v9  ;;  %v521_v22 = vadd.f32 %v520_v14, %v519_v10  ;;  %v504_v28 = vadd.f32 %v503_v17, %v502_v2  ;;  %1070 = vset.pattern.permute.xlu0 (!%p891_p2), %v1229_v50  ;;  %944 = vmatprep.subr.bf16.mxu0 (!%p891_p2), %v1230_v51 }
  0xff   : > { %v542_v23 = vsel %vm541_vm0, %v490_v18, %v483_v16  ;;  %v516_v25 = vadd.f32 %v515_v19, %v514_v11  ;;  %v945_v52 = vpack.c.bf16 (!%p891_p2), %v571_v49, %v570_v48  ;;  %566 = vperm.xlu0 (!%p891_p2), %1070, %v563_v47   ;;  %950 = vmatprep.subr.bf16.mxu1 (!%p891_p2), %v1230_v51  ;;  %v1232_v56 = vmov (!%p891_p2), 0.0  }
 0x100   : > { %v544_v24 = vsel %vm543_vm3, %v497_v15, %v542_v23  ;;  %v509_v26 = vadd.f32 %v508_v20, %v507_v12  ;;  %v529_v27 = vrot.slane %v528_v21, 2  ;;  %v522_v29 = vrot.slane %v521_v22, 2  ;;  %922 = vmatprep.mubr.msk.f32.mxu0 (!%p891_p2), %vm1231_vm10, %v1232_v56  ;;  %941 = vmatprep.mubr.msk.f32.mxu1 (!%p891_p2), %vm1231_vm10, %v1232_v56  ;;  %v894_v12 = vld [vmem:[%s1592_s6] ss:$0 sm:$0xff] (!%p891_p2) }
 0x101   : > { %v517_v30 = vrot.slane %v516_v25, 1  ;;  %v546_v33 = vsel %vm545_vm4, %v504_v28, %v544_v24  ;;  %946 = vmatpush3.bf16.msra.mxu0 (!%p891_p2), %v945_v52  ;;  %v948_v55 = vpack.c.bf16 (!%p891_p2), %v573_v54, %v572_v53  ;;  %v951_v60 = vpack.c.bf16 (!%p891_p2), %v655_v58, %v654_v57 }
 0x102   : > { %v510_v31 = vrot.slane %v509_v26, 1  ;;  %v530_v32 = vadd.f32 %v529_v27, %v528_v21  ;;  %v523_v34 = vadd.f32 %v522_v29, %v521_v22  ;;  %947 = vmatprep.subr.bf16.mxu0 (!%p891_p2), %v1230_v51  ;;  %v954_v62 = vpack.c.bf16 (!%p891_p2), %v657_v61, %v656_v59 }
 0x103   : > { %v518_v35 = vadd.f32 %v517_v30, %v516_v25  ;;  %952 = vmatpush3.bf16.msra.mxu1 (!%p891_p2), %v951_v60  ;;  %v957_v1 = vpack.c.bf16 (!%p891_p2), %v659_v0, %v658_v63  ;;  %v960_v7 = vpack.c.bf16 (!%p891_p2), %v661_v6, %v660_v5 }
 0x104   : > { %v511_v36 = vadd.f32 %v510_v31, %v509_v26  ;;  %v531_v37 = vrot.slane %v530_v32, 1  ;;  %v524_v38 = vrot.slane %v523_v34, 1  ;;  %953 = vmatprep.subr.bf16.mxu1 (!%p891_p2), %v1230_v51 }
 0x105   : > { %949 = vmatpush3.bf16.msra.mxu0 (!%p891_p2), %v948_v55 }
 0x106   : > { %v548_v39 = vsel %vm547_vm5, %v511_v36, %v546_v33  ;;  %v532_v40 = vadd.f32 %v531_v37, %v530_v32  ;;  %v525_v41 = vadd.f32 %v524_v38, %v523_v34  ;;  %561 = sbr.rel (%p891_p2) target bundleno = 816 (0x330), region = 60 }
 0x107   : > { %v550_v43 = vsel %vm549_vm6, %v518_v35, %v548_v39  ;;  %955 = vmatpush3.bf16.msra.mxu1 (!%p891_p2), %v954_v62 }
 0x108   : > { %v552_v44 = vsel %vm551_vm7, %v525_v41, %v550_v43  ;;  %956 = vmatprep.subr.bf16.mxu1 (!%p891_p2), %v1230_v51 }
 0x109   : > { %v554_v45 = vsel %vm553_vm8, %v532_v40, %v552_v44 }
 0x10a   : > { %v556_v46 = vadd.f32 %v554_v45, %v475_v42 }
 0x10b   : > { %958 = vmatpush3.bf16.msra.mxu1 (!%p891_p2), %v957_v1 }
 0x10c   : > { %557 = vst.msk [vmem:[#allocation2] sm:$0xff] %vm476_vm9, %v556_v46  ;;  %959 = vmatprep.subr.bf16.mxu1 (!%p891_p2), %v1230_v51 }
 0x10f   : > { %961 = vmatpush3.bf16.msra.mxu1 %v960_v7 }
 0x113   : > { %v562_v2 = vld [vmem:[#allocation2] sm:$0xff] }
 0x17e   : > { %v567_v3 = vpop.permute.xlu0 %566 }
 0x17f   : > { %v569_v4 = vmul.f32 %v567_v3, %v562_v2 }
 0x181   : > { %923 = vmatmul.mubr.msk.f32.vlgmr.msra.gmra.mrb[0].mxu0 %vm476_vm9, %v569_v4  ;;  %vm744_vm9 = vcmask 392192  }
 0x254   : > { %v650_v9 = vpop.f32.mrb[0].mxu0 }
 0x255   : > { %v651_v10 = vadd.f32 %v892_v8, %v650_v9  ;;  %v924_v11 = vpop.f32.mrb[1].mxu0 }
 0x257   : > { %942 = vmatmul.mubr.msk.f32.vlgmr.msra.gmra.mrb[0].mxu1 %vm669_vm11, %v651_v10 }
 0x32a   : > { %v739_v13 = vpop.f32.mrb[0].mxu1 }
 0x32b   : > { %v740_v14 = vadd.f32 %v894_v12, %v739_v13  ;;  %v943_v15 = vpop.f32.mrb[1].mxu1 }
 0x32d   : > { %v743_v16 = vmax.f32 %v740_v14, 0.0 }
 0x32f   : > { %745 = vst.msk [vmem:[%s345_s17] sm:$0xff] %vm744_vm9, %v743_v16 }
 0x330 PF: > { %s897_s10 = sshll.u32 %s1209_s8, 7  ;;  %s1610_s19 = sld [smem:[#allocation15_spill]] }
 0x331   : > { %s760_s15 = sshll.u32 %s345_s17, 4  ;;  %s747_s18 = scalar_lea.sflag [#allocation5], %s343_s14  ;;  %s761_s15 = int_to_ptr.vmem [resolvable:$true] %s760_s15 }
 0x332   : > { %s1099_s29 = scalar_lea.vmem %s761_s15, 128  ;;  %s1233_s27 = smov [#allocation6]  }
 0x333   : > { %p1100_p4 = scmp.ne.s32.totalorder %s761_s15, %s1099_s29  ;;  %s1103_s16 = sshll.u32 %s1233_s27, 4  ;;  %s1104_s16 = int_to_ptr.vmem [resolvable:$false] %s1103_s16 }
 0x334   : > { %s1105_s12 = scalar_lea.vmem %s1104_s16, 256  ;;  %p1106_p9 = scmp.lt.s32.totalorder %s761_s15, %s1104_s16 }
 0x335   : > { %p1101_p5 = pnand %p1100_p4, %p1356_p12  ;;  %p1107_p10 = scmp.lt.s32.totalorder %s1105_s12, %s1099_s29 }
 0x336   : > { %s1526_s13 = scalar_lea.hbm %s1610_s19, %s897_s10 }
 0x337   : > { %p1102_p6 = pneg %p1101_p5  ;;  %p1108_p11 = por %p1107_p10, %p1106_p9 }
 0x339   : > { %p1109_p8 = pnand %p1108_p11, %p1102_p6 }
 0x33b   : > { %1112 = shalt.err (!%p1109_p8)
}
 0x33c   : > { %s1113_s8 = scalar_lea.hbm %s1526_s13, 128  ;;  %s1117_s17 = scalar_lea.hbm %s1610_s19, 256 }
 0x33d   : > { %p1114_p13 = scmp.ne.s32.totalorder %s1526_s13, %s1113_s8  ;;  %p1118_p3 = scmp.lt.u32.totalorder %s1526_s13, %s1610_s19 }
 0x33e   : > { %p1119_p7 = scmp.lt.u32.totalorder %s1117_s17, %s1113_s8  ;;  %p1121_p4 = scmp.lt.u32.totalorder %s1113_s8, %s1526_s13 }
 0x33f   : > { %p1115_p0 = pnand %p1114_p13, %p1356_p12 }
 0x340   : > { %p1120_p2 = por %p1119_p7, %p1118_p3 }
 0x341   : > { %p1116_p1 = pneg %p1115_p0 }
 0x342   : > { %p1122_p5 = por %p1121_p4, %p1120_p2 }
 0x344   : > { %p1123_p6 = pnand %p1122_p5, %p1116_p1 }
 0x346   : > { %1126 = shalt.err (!%p1123_p6)
}
 0x347   : > { %964 = dma.vmem_to_hbm [thread:$0]  (%p1356_p12), %s761_s15, 128, %s1526_s13, %s747_s18  }
 0x348 PF: > { %p970_p9 = scmp.ge.s32.totalorder %s1221_s11, 2  ;;  %s772_s20 = sand.u32 1, %s1181_s24  }
 0x349   : > { %p1611_p10 = scmp.ne.s32.totalorder %s1609_s7, 0  ;;  %s773_s30 = scalar_lea.sflag [#allocation5], %s772_s20 }
 0x34b   : > { %p967_p11 = pnand %p970_p9, %p1611_p10 }
 0x34d   : > { %1176 = dma.done.wait (!%p967_p11), %s773_s30, 128  }
 0x34e   : > { %1178 = vsyncadd (!%p967_p11), %s773_s30, 4294967168  ;;  %s23_s11 = sadd.s32 1, %s1221_s11   ;;  %s1612_s29 = sld [smem:[#allocation13_spill]] }
 0x34f   : > { %p20_p8 = scmp.ge.s32.totalorder %s23_s11, 8   ;;  %s1613_s23 = sld [smem:[#allocation9_spill]] }
 0x350   : > { %s1614_s13 = sld [smem:[#allocation14_spill]]  ;;  %s1615_s8 = sld [smem:[#allocation10_spill]] }
 0x351   : > { %s1616_s15 = sld [smem:[#allocation11_spill]]  ;;  %s1617_s10 = sld [smem:[#allocation12_spill]] }
 0x352   : > { %s1618_s24 = smov %s1185_s25  ;;  %s1619_s25 = smov %s1189_s26 }
 0x353   : > { %s1621_s27 = smov %s1197_s28  ;;  %s1624_s30 = smov %s1213_s9 }
 0x354   : > { %s1620_s26 = smov %s1612_s29  ;;  %22 = sbr.rel (!%p20_p8) target bundleno = 11 (0xb), region = 107 }
 0x355   : > { %s1622_s28 = smov %s1613_s23 }
 0x356   : > { %s1623_s29 = smov %s1614_s13 }
 0x357   : > { %s1625_s9 = smov %s1616_s15 }
 0x35b   :  { %778 = vsyncpa [#allocation4], 1 }
 0x35c   :  { %780 = vsyncpa [#allocation4 + $0x1], 1 }
 0x35d   :  { %781 = vsyncpa [#allocation5], 1 }
 0x35e   :  { %783 = vsyncpa [#allocation5 + $0x1], 1 }

</bundles_post_ra>
